<compile_context>
chip_gen: v6e
topology: v6e:2x2x1
jax: 0.10.0
libtpu: 0.0.40
codegen_flags: <defaults>
</compile_context>

<pallas_src>
import jax
import jax.numpy as jnp
from jax.experimental import pallas as pl
from jax.experimental.pallas import tpu as pltpu

IN_FEATURES = 10
OUT_FEATURES = 10
DEFAULT_BATCH_TILE = 4096


def _round_up(n: int, m: int) -> int:
    return ((n + m - 1) // m) * m


def fused_linear_relu_kernel(x_ref, w_ref, b_ref, o_ref):
    """y = relu(x @ W_eff + b_eff) on one (bt, 10) batch tile."""
    y = jnp.dot(x_ref[...], w_ref[...], preferred_element_type=jnp.float32) + b_ref[...]
    o_ref[...] = jnp.maximum(y, 0.0).astype(o_ref.dtype)


def simple_model_forward(x, w1, b1, w2, b2, *, batch_tile=DEFAULT_BATCH_TILE):
    """x: (B, 10); w1/w2: (out, in) PyTorch layout; b1/b2: (out,). Returns (B, 10)."""
    B = x.shape[0]

    # ---- wrapper-side glue (tiny, not the hot path) ------------------------------
    # Algebraic fusion of the two linears (no nonlinearity in between):
    #   y = (x @ W1^T + b1) @ W2^T + b2 = x @ (W1^T @ W2^T) + (b1 @ W2^T + b2)
    w_eff = (w1.T @ w2.T).astype(jnp.float32)              # (10, 10)
    b_eff = (b1 @ w2.T + b2).astype(jnp.float32).reshape(1, -1)  # (1, 10)

    # Batch tile: multiple of 8 (sublane), large to amortize per-step overhead, but
    # no larger than ~half the batch so v7x gets >=2 grid steps for nontrivial B.
    half_b = _round_up(max((B + 1) // 2, 1), 8)
    bt = max(8, min(_round_up(batch_tile, 8), half_b))
    B_pad = _round_up(B, bt)

    # Batch-pad only; padded rows just produce relu(b_eff) garbage that we slice off.
    x_f32 = x.astype(jnp.float32)
    if B_pad != B:
        x_f32 = jnp.pad(x_f32, ((0, B_pad - B), (0, 0)))    # (B_pad, 10)

    grid = (B_pad // bt,)

    out_pad = pl.pallas_call(
        fused_linear_relu_kernel,
        out_shape=jax.ShapeDtypeStruct((B_pad, OUT_FEATURES), jnp.float32),
        grid=grid,
        in_specs=[
            pl.BlockSpec((bt, IN_FEATURES), lambda i: (i, 0)),            # x streams over batch
            pl.BlockSpec((IN_FEATURES, OUT_FEATURES), lambda i: (0, 0)),  # W_eff VMEM-resident
            pl.BlockSpec((1, OUT_FEATURES), lambda i: (0, 0)),            # b_eff VMEM-resident
        ],
        out_specs=pl.BlockSpec((bt, OUT_FEATURES), lambda i: (i, 0)),
        compiler_params=pltpu.CompilerParams(
            dimension_semantics=("parallel",),      # v7x: shard batch over both TCs
        ),
    )(x_f32, w_eff, b_eff)

    return out_pad[:B] if B_pad != B else out_pad


def _reference(x, w1, b1, w2, b2):
    h = x @ w1.T + b1
    y = h @ w2.T + b2
    return jnp.maximum(y, 0.0)


if __name__ == "__main__":
    key = jax.random.PRNGKey(0)
    k_x, k_w1, k_b1, k_w2, k_b2 = jax.random.split(key, 5)

    # PyTorch-default-like uniform init with bound 1/sqrt(fan_in).
    bound = 1.0 / jnp.sqrt(jnp.float32(IN_FEATURES))
    w1 = jax.random.uniform(k_w1, (OUT_FEATURES, IN_FEATURES), jnp.float32, -bound, bound)
    b1 = jax.random.uniform(k_b1, (OUT_FEATURES,), jnp.float32, -bound, bound)
    w2 = jax.random.uniform(k_w2, (OUT_FEATURES, OUT_FEATURES), jnp.float32, -bound, bound)
    b2 = jax.random.uniform(k_b2, (OUT_FEATURES,), jnp.float32, -bound, bound)

    # Small batch (matches the unit-test scale of the original module).
    B = 8
    x = jax.random.normal(k_x, (B, IN_FEATURES), dtype=jnp.float32)

    out = simple_model_forward(x, w1, b1, w2, b2)
    out = jax.block_until_ready(out)
    ref = _reference(x, w1, b1, w2, b2)
    assert out.shape == (B, OUT_FEATURES), out.shape
    assert jnp.allclose(out, ref, atol=1e-5, rtol=1e-5), "mismatch vs reference (B=8)"

    # Also exercise the multi-tile / batch-padding path (B not a tile multiple, grid > 1).
    B2 = 300
    x2 = jax.random.normal(jax.random.PRNGKey(1), (B2, IN_FEATURES), dtype=jnp.float32)
    out2 = simple_model_forward(x2, w1, b1, w2, b2, batch_tile=128)
    out2 = jax.block_until_ready(out2)
    ref2 = _reference(x2, w1, b1, w2, b2)
    assert out2.shape == (B2, OUT_FEATURES), out2.shape
    assert jnp.allclose(out2, ref2, atol=1e-5, rtol=1e-5), "mismatch vs reference (B=300)"

    print("KERNEL_OK")
</pallas_src>

<mosaic_0001>
module attributes {stable_mosaic.version = 11 : i64} {
  func.func @fused_linear_relu_kernel(%arg0: i32, %arg1: memref<8x10xf32, #tpu.memory_space<vmem>>, %arg2: memref<10x10xf32, #tpu.memory_space<vmem>>, %arg3: memref<1x10xf32, #tpu.memory_space<vmem>>, %arg4: memref<8x10xf32, #tpu.memory_space<vmem>>) attributes {dimension_semantics = [#tpu.dimension_semantics<parallel>], iteration_bounds = array<i64: 1>, scalar_prefetch = 0 : i64, scratch_operands = 0 : i64, tpu.core_type = #tpu.core_type<tc>, window_params = [{transform_indices = @transform_0, window_bounds = array<i64: 8, 10>}, {pipeline_mode = #tpu.pipeline_mode<synchronous>, transform_indices = @transform_1, window_bounds = array<i64: 10, 10>}, {pipeline_mode = #tpu.pipeline_mode<synchronous>, transform_indices = @transform_2, window_bounds = array<i64: 1, 10>}, {transform_indices = @transform_3, window_bounds = array<i64: 8, 10>}]} {
    %c0 = arith.constant 0 : index
    %c0_0 = arith.constant 0 : index
    %0 = vector.load %arg1[%c0, %c0_0] : memref<8x10xf32, #tpu.memory_space<vmem>>, vector<8x10xf32>
    %c0_1 = arith.constant 0 : index
    %c0_2 = arith.constant 0 : index
    %1 = vector.load %arg2[%c0_1, %c0_2] : memref<10x10xf32, #tpu.memory_space<vmem>>, vector<10x10xf32>
    %cst = arith.constant dense<0.000000e+00> : vector<8x10xf32>
    %2 = tpu.matmul %0, %1, %cst {dimension_numbers = #tpu.dot_dimension_numbers<[1], [0], [0], [1], [0, 0, 1, 1], [], []>} : vector<8x10xf32>, vector<10x10xf32>, vector<8x10xf32> -> vector<8x10xf32>
    %c0_3 = arith.constant 0 : index
    %c0_4 = arith.constant 0 : index
    %3 = vector.load %arg3[%c0_3, %c0_4] : memref<1x10xf32, #tpu.memory_space<vmem>>, vector<1x10xf32>
    %4 = vector.broadcast %3 : vector<1x10xf32> to vector<8x10xf32>
    %5 = arith.addf %2, %4 : vector<8x10xf32>
    %cst_5 = arith.constant 0.000000e+00 : f32
    %6 = vector.broadcast %cst_5 : f32 to vector<8x10xf32>
    %7 = arith.maximumf %5, %6 : vector<8x10xf32>
    %c0_6 = arith.constant 0 : index
    %c0_7 = arith.constant 0 : index
    %8 = vector.load %arg4[%c0_6, %c0_7] : memref<8x10xf32, #tpu.memory_space<vmem>>, vector<8x10xf32>
    tpu.vector_store %arg4[%c0_6, %c0_7], %7 {strides = array<i32>} : memref<8x10xf32, #tpu.memory_space<vmem>>, vector<8x10xf32>,
    return
  }
  func.func @transform_0(%arg0: i32) -> (i32, i32) {
    %c0_i32 = arith.constant 0 : i32
    %c0_i32_0 = arith.constant 0 : i32
    return %arg0, %c0_i32 : i32, i32
  }
  func.func @transform_1(%arg0: i32) -> (i32, i32) {
    %c0_i32 = arith.constant 0 : i32
    %c0_i32_0 = arith.constant 0 : i32
    %c0_i32_1 = arith.constant 0 : i32
    return %c0_i32, %c0_i32_0 : i32, i32
  }
  func.func @transform_2(%arg0: i32) -> (i32, i32) {
    %c0_i32 = arith.constant 0 : i32
    %c0_i32_0 = arith.constant 0 : i32
    %c0_i32_1 = arith.constant 0 : i32
    return %c0_i32, %c0_i32_0 : i32, i32
  }
  func.func @transform_3(%arg0: i32) -> (i32, i32) {
    %c0_i32 = arith.constant 0 : i32
    %c0_i32_0 = arith.constant 0 : i32
    return %arg0, %c0_i32 : i32, i32
  }
}

</mosaic_0001>

<bundles_post_ra>
// kernel: tpu_custom_call.1
= control target key start
LH: loop header
LB: loop body
LE: loop exit
PB: predicated region body
PF: predicated region fallthrough
CT: control target
= control target key end

     0   :  { %8 = vsyncpa [#allocation3], 0  ;;  %s272_s0 = inlined_call_operand.hbm [shape: f32[8,10], index: 0, kind: input, shape index: {}]   ;;  %s273_s1 = inlined_call_operand.hbm [shape: f32[10,10], index: 1, kind: input, shape index: {}]   ;;  %s274_s2 = inlined_call_operand.vmem [shape: f32[1,10], index: 2, kind: input, shape index: {}]   ;;  %s275_s3 = inlined_call_operand.hbm [shape: f32[8,10], index: 3, kind: output, shape index: {}]  }
   0x1   :  { %9 = vsyncpa [#allocation6], 0 }
   0x2   :  { %10 = vsyncpa [#allocation4], 0  ;;  %s233_s12 = smov [#allocation2]   ;;  %s234_s14 = smov [#allocation5]  }
   0x3   :  { %s17_s13 = sshll.u32 %s233_s12, 4  ;;  %s26_s15 = sshll.u32 %s234_s14, 4  ;;  %s18_s13 = int_to_ptr.vmem [resolvable:$true] %s17_s13  ;;  %s27_s15 = int_to_ptr.vmem [resolvable:$true] %s26_s15 }
   0x4   :  { %s175_s16 = scalar_lea.vmem %s18_s13, 128  ;;  %p180_p1 = scmp.lt.s32.totalorder %s18_s13, %s18_s13 }
   0x5   :  { %p176_p0 = scmp.ne.s32.totalorder %s18_s13, %s175_s16  ;;  %p181_p2 = scmp.lt.s32.totalorder %s175_s16, %s175_s16 }
   0x7   :  { %p182_p3 = por %p181_p2, %p180_p1 }
   0x9   :  { %p183_p4 = pnand %p182_p3, %p176_p0 }
   0xb   :  { %186 = shalt.err (!%p183_p4)
}
   0xc   :  { %20 = dma.hbm_to_vmem [thread:$0]  %s272_s0, 128, %s18_s13, [#allocation3]  }
   0xd   :  { %s195_s19 = scalar_lea.vmem %s27_s15, 256  ;;  %p200_p6 = scmp.lt.s32.totalorder %s27_s15, %s27_s15 }
   0xe   :  { %p196_p5 = scmp.ne.s32.totalorder %s27_s15, %s195_s19  ;;  %p201_p7 = scmp.lt.s32.totalorder %s195_s19, %s195_s19 }
  0x10   :  { %p202_p8 = por %p201_p7, %p200_p6 }
  0x12   :  { %p203_p9 = pnand %p202_p8, %p196_p5 }
  0x14   :  { %206 = shalt.err (!%p203_p9)
}
  0x15   :  { %s235_s20 = smov 128   ;;  %s236_s21 = smov 8  }
  0x16   :  { %32 = dma.hbm_to_vmem [thread:$0]  %s273_s1, 256, %s27_s15, [#allocation6], %s235_s20, %s235_s20, %s236_s21  }
  0x17   :  { %227 = dma.done.wait [#allocation3], 128  }
  0x18   :  { %228 = vsyncadd [#allocation3], 4294967168 }
  0x19   :  { %229 = dma.done.wait [#allocation6], 256  }
  0x1a   :  { %230 = vsyncadd [#allocation6], 4294967040  ;;  %v237_v0 = vmov 0.0   ;;  %vm238_vm0 = vmmov 0   ;;  %vm55_vm1 = vcmask 1041408   ;;  %v42_v2 = vld [vmem:[#allocation5] sm:$0xff] }
  0x1b   :  { %153 = vmatprep.subr.mxu0 %v237_v0  ;;  %157 = vmatprep.mubr.msk.f32.mxu0 %vm238_vm0, %v237_v0  ;;  %v43_v1 = vld [vmem:[#allocation5 + $0x8] sm:$0x3]  ;;  %v41_v3 = vld [vmem:[#allocation2] sm:$0xff]  ;;  %vm51_vm2 = vcmask 80896   ;;  %s239_s1 = smov [#allocation7]  }
  0x1c   :  { %154 = vmatpush3.msk.msra.mxu0 %vm55_vm1, %v43_v1  ;;  %v147_v4 = vld [vmem:[%s274_s2] ss:$0 sm:$0xff]  ;;  %s137_s25 = sshll.u32 %s239_s1, 4  ;;  %s138_s25 = int_to_ptr.vmem [resolvable:$true] %s137_s25 }
  0x1d   :  { %155 = vmatprep.subr.mxu0 %v237_v0  ;;  %s207_s26 = scalar_lea.vmem %s138_s25, 128  ;;  %p212_p11 = scmp.lt.s32.totalorder %s138_s25, %s138_s25 }
  0x1e   :  { %156 = vmatpush3.msra.mxu0 %v42_v2  ;;  %p208_p10 = scmp.ne.s32.totalorder %s138_s25, %s207_s26  ;;  %p213_p12 = scmp.lt.s32.totalorder %s207_s26, %s207_s26 }
  0x1f   :  { %158 = vmatmul.mubr.msk.f32.vlgmr.msra.gmra.mxu0 %vm51_vm2, %v41_v3 }
  0x20   :  { %p214_p13 = por %p213_p12, %p212_p11 }
  0x22   :  { %p215_p0 = pnand %p214_p13, %p208_p10 }
  0xdf   :  { %v125_v5 = vpop.f32.mrf.mxu0 }
  0xe0   :  { %v126_v6 = vadd.f32 %v147_v4, %v125_v5 }
  0xe1   :  { %v159_v7 = vpop.f32.mrf.mxu0 }
  0xe2   :  { %v129_v8 = vmax.f32 %v126_v6, 0.0 }
  0xe4   :  { %130 = vst.msk [vmem:[#allocation7] sm:$0xff] %vm51_vm2, %v129_v8 }
  0xe5   :  { %218 = shalt.err (!%p215_p0)
}
  0xe6   :  { %140 = dma.vmem_to_hbm [thread:$0]  %s138_s25, 128, %s275_s3, [#allocation4]  }
  0xe7   :  { %231 = dma.done.wait [#allocation4], 128  }
  0xe8   :  { %232 = vsyncadd [#allocation4], 4294967168 }
  0xe9   :  { %144 = vsyncpa [#allocation3], 1 }
  0xea   :  { %145 = vsyncpa [#allocation6], 1 }
  0xeb   :  { %146 = vsyncpa [#allocation4], 1 }

</bundles_post_ra>
